<compile_context>
chip_gen: v7x
topology: tpu7x:2x2x1
jax: 0.10.0
libtpu: 0.0.40
codegen_flags: <defaults>
</compile_context>

<pallas_src>
import jax
import jax.numpy as jnp
import numpy as np
from jax import lax
from jax.experimental import pallas as pl
from jax.experimental.pallas import tpu as pltpu

# Module hyper-params (ActorNet.__init__ defaults: m=3, f=3)
M_ASSETS = 3              # m : number of assets (conv "height")
F_FEAT   = 3              # f : feature channels
K1, K2, K3 = 3, 5, 1      # (1,3), (1,5), (1,1) kernels act only along width
WIN   = 7                 # input window width
W1OUT = WIN - (K1 - 1)    # 5
W2OUT = W1OUT - (K2 - 1)  # 1
C3IN  = F_FEAT + 1        # channels after cat(prevWeights, conv2-out)
C3OUT = F_FEAT + 1

IN_DIM = F_FEAT * M_ASSETS * WIN       # 63  (NCHW flatten of Xt)
N1     = F_FEAT * M_ASSETS * W1OUT     # 45  (conv1 out, NCHW flatten)
N2     = F_FEAT * M_ASSETS * W2OUT     # 9   (conv2 out, NCHW flatten = channel-major)
N3     = C3OUT * M_ASSETS * W2OUT      # 12  (conv3 out, torch .view(B,-1) order)
OUT_DIM = 1 + N3                       # 13  (ones-logit + conv3 flat)
SLAB   = IN_DIM + M_ASSETS + 1         # 67  (x ++ prevWeights ++ constant-1 row)


# ---------------------------------------------------------------------------
# Host-side (build-once) lowering of the convolutions to dense matrices.
# ---------------------------------------------------------------------------
def _build_conv_matrix_nchw(w, b, m, win, wout, cin, cout):
    """Dense block-Toeplitz matrix: (NCHW-flat in) @ M + bias == NCHW-flat conv out."""
    k = w.shape[-1]
    mat = np.zeros((cin * m * win, cout * m * wout), np.float32)
    bvec = np.zeros((cout * m * wout,), np.float32)
    for co in range(cout):
        for h in range(m):
            for wo in range(wout):
                col = co * m * wout + h * wout + wo
                bvec[col] = b[co]
                for ci in range(cin):
                    for kw in range(k):
                        row = ci * m * win + h * win + (wo + kw)
                        mat[row, col] = w[co, ci, 0, kw]
    return mat, bvec


def _build_layer3_transposed(w3, b3, m, f, cout):
    """conv3 (1x1) as two transposed slabs acting on the (SLAB,) input slab and on
    h2 (channel-major).  Row 0 is the constant ones-logit (all-zero weights);
    row 1 + co*m + h follows torch's NCHW .view(B,-1) order."""
    wx = np.zeros((1 + cout * m, SLAB), np.float32)      # hits [x | prevW | 1]
    wh = np.zeros((1 + cout * m, f * m), np.float32)     # hits h2 (channel-major)
    for co in range(cout):
        for h in range(m):
            r = 1 + co * m + h
            wx[r, IN_DIM + h] = w3[co, 0, 0, 0]          # prevWeights channel
            wx[r, SLAB - 1] = b3[co]                     # bias via the ones row
            for c2 in range(f):
                wh[r, c2 * m + h] = w3[co, c2 + 1, 0, 0]
    return wx, wh


def _round_up(x, n):
    return ((x + n - 1) // n) * n


# ---------------------------------------------------------------------------
# Pallas kernel (batch on the lane axis):
#   conv1 -> tanh -> conv2 -> tanh -> (prevW, conv2) -> conv3 -> tanh
#   -> softmax over [1, conv3_flat]
# One grid step processes one (SLAB, TB) batch-column tile; weights stay resident.
# ---------------------------------------------------------------------------
def actor_kernel(x_ref, w1_ref, w2_ref, w3x_ref, w3h_ref, b2_ref, cvec_ref, o_ref):
    x = x_ref[...]                                                     # (67, TB)
    # conv1 (+bias folded via ones row) -> tanh                         (45, TB)
    h1 = jnp.tanh(jnp.dot(w1_ref[...], x, preferred_element_type=jnp.float32))
    # conv2 -> tanh                                                      (9, TB)
    h2 = jnp.tanh(jnp.dot(w2_ref[...], h1, preferred_element_type=jnp.float32)
                  + b2_ref[...])
    # conv3 on [prevWeights | h2] (+bias folded); row 0 stays 0 -> tanh(0)=0
    pre = (jnp.dot(w3x_ref[...], x, preferred_element_type=jnp.float32)
           + jnp.dot(w3h_ref[...], h2, preferred_element_type=jnp.float32))  # (13, TB)
    # softmax over [1, h3]: tanh(h3) < 1 so the max is exactly 1 (dead reduce removed).
    # cvec = [0, -1, ..., -1]  => row 0 becomes exp(0)=1, rows 1.. become exp(h3-1).
    e = jnp.exp(jnp.tanh(pre) + cvec_ref[...])                          # (13, TB)
    inv = pl.reciprocal(jnp.sum(e, axis=0, keepdims=True), approx=False)  # (1, TB)
    o_ref[...] = e * inv                                                # one dense store


def make_actor_net(params, batch_tile=4096):
    """Builds the dense conv matrices ONCE (host side) and returns a jitted
    forward(xt_nchw, prev_weights_nchw) -> (B, 13) softmax output."""
    w1, b1, w2, b2, w3, b3 = (np.asarray(p, np.float32) for p in params)
    m1_np, b1v = _build_conv_matrix_nchw(w1, b1, M_ASSETS, WIN, W1OUT, F_FEAT, F_FEAT)
    m2_np, b2v = _build_conv_matrix_nchw(w2, b2, M_ASSETS, W1OUT, W2OUT, F_FEAT, F_FEAT)
    w3x_np, w3h_np = _build_layer3_transposed(w3, b3, M_ASSETS, F_FEAT, C3OUT)

    # layer-1 transposed slab consuming [x | prevW | 1]; bias folded into ones column
    w1t_np = np.zeros((N1, SLAB), np.float32)
    w1t_np[:, :IN_DIM] = m1_np.T
    w1t_np[:, SLAB - 1] = b1v
    w2t_np = np.ascontiguousarray(m2_np.T)               # (9, 45)
    b2_np = b2v.reshape(N2, 1)                           # (9, 1)
    cvec_np = np.full((OUT_DIM, 1), -1.0, np.float32)    # softmax shift (= the max, 1)
    cvec_np[0, 0] = 0.0                                  # ones-logit row

    w1t = jnp.asarray(w1t_np)
    w2t = jnp.asarray(w2t_np)
    w3x = jnp.asarray(w3x_np)
    w3h = jnp.asarray(w3h_np)
    b2c = jnp.asarray(b2_np)
    cvec = jnp.asarray(cvec_np)

    def forward(xt, prev_weights):
        B = xt.shape[0]
        # Pure reshapes (NCHW row-major flatten); the concat + ones + transpose +
        # pad fuse into a single XLA copy that replaces both the old prevWeights
        # DMA stream and the old whole-batch jnp.pad pass.
        x_flat = xt.reshape(B, IN_DIM).astype(jnp.float32)
        pw_flat = prev_weights.reshape(B, M_ASSETS).astype(jnp.float32)
        slab = jnp.concatenate(
            [x_flat, pw_flat, jnp.ones((B, 1), jnp.float32)], axis=1)   # (B, 67)

        # Even batch split: keeps >=2 grid steps for v7x's two TensorCores when
        # B > batch_tile, lane-aligned tiles, minimal padding.
        nsteps = max(1, (B + batch_tile - 1) // batch_tile)
        tb = _round_up(-(-B // nsteps), 128)
        b_pad = nsteps * tb

        slab_t = slab.T                                                  # (67, B)
        if b_pad != B:
            slab_t = jnp.pad(slab_t, ((0, 0), (0, b_pad - B)))

        out_t = pl.pallas_call(
            actor_kernel,
            out_shape=jax.ShapeDtypeStruct((OUT_DIM, b_pad), jnp.float32),
            grid=(nsteps,),
            in_specs=[
                pl.BlockSpec((SLAB, tb), lambda i: (0, i)),          # input slab tile
                pl.BlockSpec((N1, SLAB), lambda i: (0, 0)),          # conv1ᵀ (resident)
                pl.BlockSpec((N2, N1), lambda i: (0, 0)),            # conv2ᵀ (resident)
                pl.BlockSpec((OUT_DIM, SLAB), lambda i: (0, 0)),     # conv3ᵀ (slab part)
                pl.BlockSpec((OUT_DIM, N2), lambda i: (0, 0)),       # conv3ᵀ (h2 part)
                pl.BlockSpec((N2, 1), lambda i: (0, 0)),             # conv2 bias
                pl.BlockSpec((OUT_DIM, 1), lambda i: (0, 0)),        # softmax shift
            ],
            out_specs=pl.BlockSpec((OUT_DIM, tb), lambda i: (0, i)),
            compiler_params=pltpu.CompilerParams(
                dimension_semantics=("parallel",),
                vmem_limit_bytes=32 * 1024 * 1024),
        )(slab_t, w1t, w2t, w3x, w3h, b2c, cvec)
        return out_t[:, :B].T                                            # (B, 13)

    return jax.jit(forward)


# ---------------------------------------------------------------------------
# Pure-JAX reference (for correctness check)
# ---------------------------------------------------------------------------
def actor_net_reference(xt, prev_weights, params):
    w1, b1, w2, b2, w3, b3 = params
    dn = ('NCHW', 'OIHW', 'NCHW')
    h = jnp.tanh(lax.conv_general_dilated(xt, w1, (1, 1), 'VALID',
                                          dimension_numbers=dn)
                 + b1[None, :, None, None])
    h = jnp.tanh(lax.conv_general_dilated(h, w2, (1, 1), 'VALID',
                                          dimension_numbers=dn)
                 + b2[None, :, None, None])
    h = jnp.concatenate([prev_weights, h], axis=1)
    h = jnp.tanh(lax.conv_general_dilated(h, w3, (1, 1), 'VALID',
                                          dimension_numbers=dn)
                 + b3[None, :, None, None])
    flat = h.reshape(h.shape[0], -1)
    flat = jnp.concatenate([jnp.ones((flat.shape[0], 1), flat.dtype), flat], axis=1)
    return jax.nn.softmax(flat, axis=1)


if __name__ == "__main__":
    key = jax.random.PRNGKey(0)
    ks = jax.random.split(key, 8)
    B = 2

    # Deterministic synthetic parameters (Conv2d shapes from __init__)
    w1 = (jax.random.normal(ks[0], (F_FEAT, F_FEAT, 1, K1)) * 0.3).astype(jnp.float32)
    b1 = (jax.random.normal(ks[1], (F_FEAT,)) * 0.1).astype(jnp.float32)
    w2 = (jax.random.normal(ks[2], (F_FEAT, F_FEAT, 1, K2)) * 0.3).astype(jnp.float32)
    b2 = (jax.random.normal(ks[3], (F_FEAT,)) * 0.1).astype(jnp.float32)
    w3 = (jax.random.normal(ks[4], (C3OUT, C3IN, 1, K3)) * 0.3).astype(jnp.float32)
    b3 = (jax.random.normal(ks[5], (C3OUT,)) * 0.1).astype(jnp.float32)
    params = (w1, b1, w2, b2, w3, b3)

    # Deterministic inputs (NCHW)
    xt = jax.random.normal(ks[6], (B, F_FEAT, M_ASSETS, WIN), dtype=jnp.float32)
    prev_w = jax.nn.softmax(
        jax.random.normal(ks[7], (B, 1, M_ASSETS, 1), dtype=jnp.float32), axis=2)

    forward = make_actor_net(params)            # matrices built exactly once here
    out = jax.block_until_ready(forward(xt, prev_w))
    ref = jax.block_until_ready(actor_net_reference(xt, prev_w, params))

    assert out.shape == (B, OUT_DIM)
    assert bool(jnp.allclose(out, ref, atol=2e-3, rtol=2e-3)), (out, ref)
    # exact reciprocal: rows sum to 1 to f32 rounding
    assert bool(jnp.allclose(jnp.sum(out, axis=1), jnp.ones((B,)), atol=1e-4))
    print("KERNEL_OK")
</pallas_src>

<mosaic_0001>
module attributes {stable_mosaic.version = 11 : i64} {
  func.func @actor_kernel(%arg0: i32, %arg1: memref<67x128xf32, #tpu.memory_space<vmem>>, %arg2: memref<45x67xf32, #tpu.memory_space<vmem>>, %arg3: memref<9x45xf32, #tpu.memory_space<vmem>>, %arg4: memref<13x67xf32, #tpu.memory_space<vmem>>, %arg5: memref<13x9xf32, #tpu.memory_space<vmem>>, %arg6: memref<9x1xf32, #tpu.memory_space<vmem>>, %arg7: memref<13x1xf32, #tpu.memory_space<vmem>>, %arg8: memref<13x128xf32, #tpu.memory_space<vmem>>) attributes {dimension_semantics = [#tpu.dimension_semantics<parallel>], iteration_bounds = array<i64: 1>, scalar_prefetch = 0 : i64, scratch_operands = 0 : i64, tpu.core_type = #tpu.core_type<tc>, window_params = [{transform_indices = @transform_0, window_bounds = array<i64: 67, 128>}, {pipeline_mode = #tpu.pipeline_mode<synchronous>, transform_indices = @transform_1, window_bounds = array<i64: 45, 67>}, {pipeline_mode = #tpu.pipeline_mode<synchronous>, transform_indices = @transform_2, window_bounds = array<i64: 9, 45>}, {pipeline_mode = #tpu.pipeline_mode<synchronous>, transform_indices = @transform_3, window_bounds = array<i64: 13, 67>}, {pipeline_mode = #tpu.pipeline_mode<synchronous>, transform_indices = @transform_4, window_bounds = array<i64: 13, 9>}, {pipeline_mode = #tpu.pipeline_mode<synchronous>, transform_indices = @transform_5, window_bounds = array<i64: 9, 1>}, {pipeline_mode = #tpu.pipeline_mode<synchronous>, transform_indices = @transform_6, window_bounds = array<i64: 13, 1>}, {transform_indices = @transform_7, window_bounds = array<i64: 13, 128>}]} {
    %c0 = arith.constant 0 : index
    %c0_0 = arith.constant 0 : index
    %0 = vector.load %arg1[%c0, %c0_0] : memref<67x128xf32, #tpu.memory_space<vmem>>, vector<67x128xf32>
    %c0_1 = arith.constant 0 : index
    %c0_2 = arith.constant 0 : index
    %1 = vector.load %arg2[%c0_1, %c0_2] : memref<45x67xf32, #tpu.memory_space<vmem>>, vector<45x67xf32>
    %cst = arith.constant dense<0.000000e+00> : vector<45x128xf32>
    %2 = tpu.matmul %1, %0, %cst {dimension_numbers = #tpu.dot_dimension_numbers<[1], [0], [0], [1], [0, 0, 1, 1], [], []>} : vector<45x67xf32>, vector<67x128xf32>, vector<45x128xf32> -> vector<45x128xf32>
    %3 = math.tanh %2 : vector<45x128xf32>
    %c0_3 = arith.constant 0 : index
    %c0_4 = arith.constant 0 : index
    %4 = vector.load %arg3[%c0_3, %c0_4] : memref<9x45xf32, #tpu.memory_space<vmem>>, vector<9x45xf32>
    %cst_5 = arith.constant dense<0.000000e+00> : vector<9x128xf32>
    %5 = tpu.matmul %4, %3, %cst_5 {dimension_numbers = #tpu.dot_dimension_numbers<[1], [0], [0], [1], [0, 0, 1, 1], [], []>} : vector<9x45xf32>, vector<45x128xf32>, vector<9x128xf32> -> vector<9x128xf32>
    %c0_6 = arith.constant 0 : index
    %c0_7 = arith.constant 0 : index
    %6 = vector.load %arg6[%c0_6, %c0_7] : memref<9x1xf32, #tpu.memory_space<vmem>>, vector<9x1xf32>
    %7 = vector.broadcast %6 : vector<9x1xf32> to vector<9x128xf32>
    %8 = arith.addf %5, %7 : vector<9x128xf32>
    %9 = math.tanh %8 : vector<9x128xf32>
    %c0_8 = arith.constant 0 : index
    %c0_9 = arith.constant 0 : index
    %10 = vector.load %arg4[%c0_8, %c0_9] : memref<13x67xf32, #tpu.memory_space<vmem>>, vector<13x67xf32>
    %cst_10 = arith.constant dense<0.000000e+00> : vector<13x128xf32>
    %11 = tpu.matmul %10, %0, %cst_10 {dimension_numbers = #tpu.dot_dimension_numbers<[1], [0], [0], [1], [0, 0, 1, 1], [], []>} : vector<13x67xf32>, vector<67x128xf32>, vector<13x128xf32> -> vector<13x128xf32>
    %c0_11 = arith.constant 0 : index
    %c0_12 = arith.constant 0 : index
    %12 = vector.load %arg5[%c0_11, %c0_12] : memref<13x9xf32, #tpu.memory_space<vmem>>, vector<13x9xf32>
    %cst_13 = arith.constant dense<0.000000e+00> : vector<13x128xf32>
    %13 = tpu.matmul %12, %9, %cst_13 {dimension_numbers = #tpu.dot_dimension_numbers<[1], [0], [0], [1], [0, 0, 1, 1], [], []>} : vector<13x9xf32>, vector<9x128xf32>, vector<13x128xf32> -> vector<13x128xf32>
    %14 = arith.addf %11, %13 : vector<13x128xf32>
    %15 = math.tanh %14 : vector<13x128xf32>
    %c0_14 = arith.constant 0 : index
    %c0_15 = arith.constant 0 : index
    %16 = vector.load %arg7[%c0_14, %c0_15] : memref<13x1xf32, #tpu.memory_space<vmem>>, vector<13x1xf32>
    %17 = vector.broadcast %16 : vector<13x1xf32> to vector<13x128xf32>
    %18 = arith.addf %15, %17 : vector<13x128xf32>
    %19 = math.exp %18 : vector<13x128xf32>
    %cst_16 = arith.constant dense<0.000000e+00> : vector<128xf32>
    %20 = vector.multi_reduction <add>, %19, %cst_16 [0] : vector<13x128xf32> to vector<128xf32>
    %21 = vector.shape_cast %20 : vector<128xf32> to vector<1x128xf32>
    %22 = tpu.reciprocal %21 : vector<1x128xf32> -> vector<1x128xf32>
    %23 = vector.broadcast %22 : vector<1x128xf32> to vector<13x128xf32>
    %24 = arith.mulf %19, %23 : vector<13x128xf32>
    %c0_17 = arith.constant 0 : index
    %c0_18 = arith.constant 0 : index
    %25 = vector.load %arg8[%c0_17, %c0_18] : memref<13x128xf32, #tpu.memory_space<vmem>>, vector<13x128xf32>
    tpu.vector_store %arg8[%c0_17, %c0_18], %24 {strides = array<i32>} : memref<13x128xf32, #tpu.memory_space<vmem>>, vector<13x128xf32>,
    return
  }
  func.func @transform_0(%arg0: i32) -> (i32, i32) {
    %c0_i32 = arith.constant 0 : i32
    %c0_i32_0 = arith.constant 0 : i32
    return %c0_i32, %arg0 : i32, i32
  }
  func.func @transform_1(%arg0: i32) -> (i32, i32) {
    %c0_i32 = arith.constant 0 : i32
    %c0_i32_0 = arith.constant 0 : i32
    %c0_i32_1 = arith.constant 0 : i32
    return %c0_i32, %c0_i32_0 : i32, i32
  }
  func.func @transform_2(%arg0: i32) -> (i32, i32) {
    %c0_i32 = arith.constant 0 : i32
    %c0_i32_0 = arith.constant 0 : i32
    %c0_i32_1 = arith.constant 0 : i32
    return %c0_i32, %c0_i32_0 : i32, i32
  }
  func.func @transform_3(%arg0: i32) -> (i32, i32) {
    %c0_i32 = arith.constant 0 : i32
    %c0_i32_0 = arith.constant 0 : i32
    %c0_i32_1 = arith.constant 0 : i32
    return %c0_i32, %c0_i32_0 : i32, i32
  }
  func.func @transform_4(%arg0: i32) -> (i32, i32) {
    %c0_i32 = arith.constant 0 : i32
    %c0_i32_0 = arith.constant 0 : i32
    %c0_i32_1 = arith.constant 0 : i32
    return %c0_i32, %c0_i32_0 : i32, i32
  }
  func.func @transform_5(%arg0: i32) -> (i32, i32) {
    %c0_i32 = arith.constant 0 : i32
    %c0_i32_0 = arith.constant 0 : i32
    %c0_i32_1 = arith.constant 0 : i32
    return %c0_i32, %c0_i32_0 : i32, i32
  }
  func.func @transform_6(%arg0: i32) -> (i32, i32) {
    %c0_i32 = arith.constant 0 : i32
    %c0_i32_0 = arith.constant 0 : i32
    %c0_i32_1 = arith.constant 0 : i32
    return %c0_i32, %c0_i32_0 : i32, i32
  }
  func.func @transform_7(%arg0: i32) -> (i32, i32) {
    %c0_i32 = arith.constant 0 : i32
    %c0_i32_0 = arith.constant 0 : i32
    return %c0_i32, %arg0 : i32, i32
  }
}

</mosaic_0001>

<bundles_post_ra>
// kernel: forward.1
= control target key start
LH: loop header
LB: loop body
LE: loop exit
PB: predicated region body
PF: predicated region fallthrough
CT: control target
= control target key end

     0   :  { %vm41_vm0 = vcmask 547840   ;;  %vm60_vm1 = vcmask 1042432   ;;  %vm179_vm2 = vcmask 367616   ;;  %v683_v20 = vmov 0   ;;  %s856_s0 = inlined_call_operand.vmem [shape: f32[67,128], index: 0, kind: input, shape index: {}]   ;;  %s857_s1 = inlined_call_operand.vmem [shape: f32[45,67], index: 1, kind: input, shape index: {}]   ;;  %s858_s2 = inlined_call_operand.vmem [shape: f32[9,45], index: 2, kind: input, shape index: {}]   ;;  %s859_s5 = inlined_call_operand.vmem [shape: f32[9,1], index: 5, kind: input, shape index: {}]   ;;  %s860_s4 = inlined_call_operand.vmem [shape: f32[13,9], index: 4, kind: input, shape index: {}]   ;;  %s861_s6 = inlined_call_operand.vmem [shape: f32[13,1], index: 6, kind: input, shape index: {}]   ;;  %s862_s3 = inlined_call_operand.vmem [shape: f32[13,67], index: 3, kind: input, shape index: {}]   ;;  %s863_s7 = inlined_call_operand.vmem [shape: f32[13,128], index: 7, kind: output, shape index: {}]  }
   0x1   :  { %v26_v0 = vld [vmem:[%s856_s0] sm:$0xff]  ;;  %v27_v1 = vld [vmem:[%s856_s0 + $0x8] sm:$0xff]  ;;  %v28_v2 = vld [vmem:[%s856_s0 + $0x10] sm:$0xff]  ;;  %655 = vset.pattern.permute.xlu0 %v683_v20  ;;  %656 = vset.pattern.permute.xlu1 %v683_v20  ;;  %vm186_vm3 = vcmask 1044480   ;;  %vm684_vm4 = vmmov 1   ;;  %vm271_vm6 = vcmask 72704  }
   0x2   :  { %v734_v3 = vpack.c.bf16 %v27_v1, %v26_v0  ;;  %v29_v4 = vld [vmem:[%s856_s0 + $0x18] sm:$0xff]  ;;  %v30_v6 = vld [vmem:[%s856_s0 + $0x20] sm:$0xff]  ;;  %v31_v7 = vld [vmem:[%s856_s0 + $0x28] sm:$0xff]  ;;  %vm278_vm7 = vcmask 1040384  }
   0x3   :  { %v739_v5 = vpack.c.bf16 %v29_v4, %v28_v2  ;;  %v35_v8 = vld [vmem:[%s857_s1] sm:$0xff]  ;;  %v754_v9 = vpack.c.bf16 %v31_v7, %v30_v6  ;;  %v32_v10 = vld [vmem:[%s856_s0 + $0x30] sm:$0xff]  ;;  %v33_v11 = vld [vmem:[%s856_s0 + $0x38] sm:$0xff] }
   0x4   :  { %600 = vmatprep.subr.bf16.mxu0 %v734_v3  ;;  %547 = vmatprep.mubr.msk.f32.mxu0 %vm41_vm0, %v35_v8  ;;  %v764_v12 = vpack.c.bf16 %v33_v11, %v32_v10  ;;  %v771_v13 = vld [vmem:[%s856_s0 + $0x40] sm:$0x7]  ;;  %v36_v14 = vld [vmem:[%s857_s1 + $0x8] sm:$0xff]  ;;  %v37_v15 = vld [vmem:[%s857_s1 + $0x10] sm:$0xff] }
   0x5   :  { %602 = vmatpush3.bf16.msra.mxu0 %v734_v3  ;;  %v38_v16 = vld [vmem:[%s857_s1 + $0x18] sm:$0xff]  ;;  %v39_v17 = vld [vmem:[%s857_s1 + $0x20] sm:$0xff]  ;;  %v40_v18 = vld [vmem:[%s857_s1 + $0x28] sm:$0x1f] }
   0x6   :  { %604 = vmatprep.subr.bf16.mxu0 %v739_v5  ;;  %v165_v19 = vld [vmem:[%s858_s2] sm:$0xff]  ;;  %v168_v22 = vld [vmem:[%s859_s5 + $0x8] sm:$0x1]  ;;  %vm624_vm5 = vmpackc.low %vm186_vm3, %vm684_vm4 }
   0x7   :  { %v167_v21 = vld [vmem:[%s859_s5] sm:$0xff]  ;;  %v166_v38 = vld [vmem:[%s858_s2 + $0x8] sm:$0x1]  ;;  %vm630_vm8 = vmpackc.low %vm278_vm7, %vm684_vm4 }
   0x8   :  { %171 = vperm.xlu0 %655, %v167_v21   ;;  %v269_v39 = vld [vmem:[%s860_s4] sm:$0xff]  ;;  %v441_v40 = vld [vmem:[%s861_s6 + $0x8] sm:$0x1f] }
   0x9   :  { %606 = vmatpush3.bf16.msra.mxu0 %v739_v5  ;;  %575 = vmatprep.mubr.msk.f32.mxu1 %vm271_vm6, %v269_v39  ;;  %v440_v41 = vld [vmem:[%s861_s6] sm:$0xff]  ;;  %v270_v51 = vld [vmem:[%s860_s4 + $0x8] sm:$0x1f] }
   0xa   :  { %608 = vmatprep.subr.bf16.mxu0 %v754_v9  ;;  %449 = vperm.xlu1 %656, %v441_v40   ;;  %v267_v52 = vld [vmem:[%s862_s3] sm:$0xff]  ;;  %v268_v53 = vld [vmem:[%s862_s3 + $0x8] sm:$0x1f] }
   0xc   :  { %176 = vperm.xlu0 %655, %v168_v22  }
   0xd   :  { %610 = vmatpush3.bf16.msra.mxu0 %v754_v9 }
   0xe   :  { %612 = vmatprep.subr.bf16.mxu0 %v764_v12  ;;  %444 = vperm.xlu1 %656, %v440_v41  }
  0x11   :  { %614 = vmatpush3.bf16.msra.mxu0 %v764_v12 }
  0x12   :  { %545 = vmatprep.subr.msk.mxu0 %vm60_vm1, %v771_v13 }
  0x15   :  { %546 = vmatpush3.msk.msra.mxu0 %vm60_vm1, %v771_v13 }
  0x16   :  { %548 = vmatmul.mubr.msk.f32.vlgmr.msra.gmra.mrb[0].mxu0 %vm41_vm0, %v36_v14 }
  0x17   :  { %550 = vmatprep.mubr.msk.f32.mxu0 %vm41_vm0, %v37_v15 }
  0x1a   :  { %551 = vmatmul.mubr.msk.f32.gmra.mrb[2].mxu0 %vm41_vm0, %v38_v16 }
  0x1b   :  { %553 = vmatprep.mubr.msk.f32.mxu0 %vm41_vm0, %v39_v17 }
  0x1e   :  { %554 = vmatmul.mubr.msk.f32.gmra.mrb[4].mxu0 %vm41_vm0, %v40_v18 }
  0x1f   :  { %568 = vmatprep.mubr.msk.f32.mxu0 %vm179_vm2, %v165_v19 }
  0x87   :  { %v172_v42 = vpop.permute.xlu0 %171 }
  0x89   :  { %v450_v56 = vpop.permute.xlu1 %449 }
  0x8b   :  { %v177_v43 = vpop.permute.xlu0 %176 }
  0x8d   :  { %v445_v60 = vpop.permute.xlu1 %444 }
  0xe9   :  { %v549_v23 = vpop.f32.mrb[0].mxu0 }
  0xea   :  { %657 = vtanh.f32 %v549_v23  ;;  %v130_v24 = vpop.f32.mrb[1].mxu0 }
  0xeb   :  { %659 = vtanh.f32 %v130_v24 }
  0xed   :  { %v552_v25 = vpop.f32.mrb[2].mxu0 }
  0xee   :  { %661 = vtanh.f32 %v552_v25  ;;  %v140_v26 = vpop.f32.mrb[3].mxu0 }
  0xef   :  { %663 = vtanh.f32 %v140_v26 }
  0xf1   :  { %v555_v27 = vpop.f32.mrb[4].mxu0 }
  0xf2   :  { %665 = vtanh.f32 %v555_v27  ;;  %v150_v28 = vpop.f32.mrb[5].mxu0 }
  0xf3   :  { %667 = vtanh.f32 %v150_v28 }
  0xf4   :  { %v658_v29 = vpop.eup %657 }
  0xf5   :  { %v660_v30 = vpop.eup %659 }
  0xf6   :  { %v615_v31 = vpack.c.bf16 %v658_v29, %v660_v30 }
  0xf8   :  { %v662_v32 = vpop.eup %661  ;;  %616 = vmatprep.subr.bf16.mxu0 %v615_v31 }
  0xf9   :  { %v664_v33 = vpop.eup %663  ;;  %618 = vmatpush3.bf16.msra.mxu0 %v615_v31 }
  0xfa   :  { %v619_v34 = vpack.c.bf16 %v662_v32, %v664_v33 }
  0xfc   :  { %v666_v35 = vpop.eup %665  ;;  %620 = vmatprep.subr.bf16.mxu0 %v619_v34 }
  0xfd   :  { %v668_v36 = vpop.eup %667  ;;  %622 = vmatpush3.bf16.msra.mxu0 %v619_v34 }
  0xfe   :  { %v623_v37 = vpack.c.bf16 %v666_v35, %v668_v36 }
 0x100   :  { %625 = vmatprep.subr.msk.bf16.mxu0 %vm624_vm5, %v623_v37 }
 0x101   :  { %628 = vmatpush3.bf16.msk.msra.mxu0 %vm624_vm5, %v623_v37 }
 0x104   :  { %569 = vmatmul.mubr.msk.f32.vlgmr.msra.gmra.mrb[6].mxu0 %vm179_vm2, %v166_v38 }
 0x1d7   :  { %v570_v44 = vpop.f32.mrb[6].mxu0 }
 0x1d8   :  { %v262_v45 = vadd.f32 %v570_v44, %v177_v43  ;;  %v256_v46 = vpop.f32.mrb[7].mxu0 }
 0x1d9   :  { %v257_v47 = vadd.f32 %v256_v46, %v172_v42 }
 0x1da   :  { %669 = vtanh.f32 %v262_v45 }
 0x1db   :  { %671 = vtanh.f32 %v257_v47 }
 0x1e4   :  { %v670_v48 = vpop.eup %669 }
 0x1e5   :  { %v672_v49 = vpop.eup %671 }
 0x1e6   :  { %v629_v50 = vpack.c.bf16 %v670_v48, %v672_v49 }
 0x1e8   :  { %631 = vmatprep.subr.msk.bf16.mxu1 %vm630_vm8, %v629_v50 }
 0x1e9   :  { %634 = vmatpush3.bf16.msk.msra.mxu1 %vm630_vm8, %v629_v50 }
 0x1ea   :  { %636 = vmatprep.subr.bf16.mxu1 %v734_v3 }
 0x1ec   :  { %576 = vmatmul.mubr.msk.f32.vlgmr.msra.gmra.mrb[0].mxu1 %vm271_vm6, %v270_v51 }
 0x1ed   :  { %638 = vmatpush3.bf16.msra.mxu1 %v734_v3  ;;  %596 = vmatprep.mubr.msk.f32.mxu1 %vm41_vm0, %v267_v52 }
 0x1ee   :  { %640 = vmatprep.subr.bf16.mxu1 %v739_v5 }
 0x1f1   :  { %642 = vmatpush3.bf16.msra.mxu1 %v739_v5 }
 0x1f2   :  { %644 = vmatprep.subr.bf16.mxu1 %v754_v9 }
 0x1f5   :  { %646 = vmatpush3.bf16.msra.mxu1 %v754_v9 }
 0x1f6   :  { %648 = vmatprep.subr.bf16.mxu1 %v764_v12 }
 0x1f9   :  { %650 = vmatpush3.bf16.msra.mxu1 %v764_v12 }
 0x1fa   :  { %594 = vmatprep.subr.msk.mxu1 %vm60_vm1, %v771_v13 }
 0x1fd   :  { %595 = vmatpush3.msk.msra.mxu1 %vm60_vm1, %v771_v13 }
 0x1fe   :  { %597 = vmatmul.mubr.msk.f32.vlgmr.msra.gmra.mrb[0].mxu1 %vm41_vm0, %v268_v53 }
 0x2d1   :  { %v598_v54 = vpop.f32.mrb[0].mxu1 }
 0x2d2   :  { %673 = vtanh.f32 %v598_v54  ;;  %v429_v55 = vpop.f32.mrb[1].mxu1 }
 0x2d3   :  { %675 = vtanh.f32 %v429_v55 }
 0x2dc   :  { %v674_v57 = vpop.eup %673 }
 0x2dd   :  { %v676_v58 = vpop.eup %675  ;;  %v453_v59 = vadd.f32 %v674_v57, %v450_v56 }
 0x2de   :  { %v452_v61 = vadd.f32 %v676_v58, %v445_v60 }
 0x2df   :  { %v456_v62 = vmul.f32 1.442695, %v453_v59 }
 0x2e0   :  { %v454_v63 = vmul.f32 1.442695, %v452_v61 }
 0x2e1   :  { %677 = vpow2.f32 %v456_v62 }
 0x2e2   :  { %679 = vpow2.f32 %v454_v63 }
 0x2eb   :  { %v678_v0 = vpop.eup %677 }
 0x2ec   :  { %v680_v1 = vpop.eup %679  ;;  %v458_v2 = vsel %vm186_vm3, %v678_v0, 0.0 }
 0x2ed   :  { %v459_v3 = vadd.f32 %v680_v1, %v458_v2 }
 0x2ef   :  { %v460_v4 = vrot.slane %v459_v3, 4 }
 0x2f1   :  { %v461_v5 = vadd.f32 %v460_v4, %v459_v3 }
 0x2f3   :  { %v462_v6 = vrot.slane %v461_v5, 2 }
 0x2f5   :  { %v463_v7 = vadd.f32 %v462_v6, %v461_v5 }
 0x2f7   :  { %v464_v8 = vrot.slane %v463_v7, 1 }
 0x2f9   :  { %v465_v9 = vadd.f32 %v464_v8, %v463_v7 }
 0x2fb   :  { %681 = vrcp.f32 %v465_v9 }
 0x305   :  { %v682_v10 = vpop.eup %681 }
 0x306   :  { %v467_v11 = vmul.f32 %v682_v10, %v680_v1  ;;  %v468_v12 = vmul.f32 %v682_v10, %v678_v0 }
 0x308   :  { %469 = vst [vmem:[%s863_s7] sm:$0xff] %v467_v11  ;;  %470 = vst [vmem:[%s863_s7 + $0x8] sm:$0x1f] %v468_v12 }

</bundles_post_ra>
